<compile_context>
chip_gen: v6e
topology: v6e:2x2x1
jax: 0.10.0
libtpu: 0.0.40
codegen_flags: <defaults>
</compile_context>

<pallas_src>
from functools import partial

import jax
import jax.numpy as jnp
from jax.experimental import pallas as pl
from jax.experimental.pallas import tpu as pltpu


def _choose_block_images(N, C, HW):
    """Images per grid step: keep >=2 grid steps when N>=2 (megacore), cap patch VMEM."""
    if N <= 1:
        return 1
    cap = max(1, (2 * 1024 * 1024) // (9 * C * HW * 2))   # bf16 im2col slab <= ~2 MiB
    best = 1
    for cand in range(1, N // 2 + 1):                      # grid = N // cand >= 2
        if N % cand == 0 and cand <= cap:
            best = cand
    return best


@partial(jax.jit, static_argnames=("num_groups", "eps", "block_images"))
def residual_block_forward(x_nchw, params, num_groups, eps=1e-5, block_images=None):
    """x_nchw: (N, C, H, W) float32 -> (N, C, H, W) float32 (stride=1, group norm)."""
    N, C, H, W = x_nchw.shape
    assert params["w1"].shape == (C, C, 3, 3), "stride=1 residual path needs in_planes == planes"
    HW = H * W
    M = W + 1                      # zero margin: covers all |row| shifts of a 3x3 tap
    cg = C // num_groups
    B = _choose_block_images(N, C, HW) if block_images is None else block_images
    assert N % B == 0

    # ----------------------- host-side glue (parameters only) -----------------------
    x_flat = x_nchw.reshape(N, C, HW)                       # metadata-only reshape

    # conv weights OIHW -> (C_out, 9*C_in) bf16, K ordered (dy, dx, c_in)
    w1t = jnp.transpose(params["w1"], (0, 2, 3, 1)).reshape(C, 9 * C).astype(jnp.bfloat16)
    w2t = jnp.transpose(params["w2"], (0, 2, 3, 1)).reshape(C, 9 * C).astype(jnp.bfloat16)

    # per-channel params packed into one (C, 8) slab: [b1 g1 be1 b2 g2 be2 0 0]
    zc = jnp.zeros((C,), jnp.float32)
    pp = jnp.stack([params["b1"], params["g1"], params["be1"],
                    params["b2"], params["g2"], params["be2"], zc, zc],
                   axis=1).astype(jnp.float32)

    # group-averaging matrix: gavg[c, c'] = 1/(H*W*cg) iff c, c' in the same group
    cidx = jnp.arange(C)
    same = (cidx[:, None] // cg) == (cidx[None, :] // cg)
    gavg = same.astype(jnp.float32) / float(HW * cg)

    # ------------------------------- fused kernel ------------------------------------
    def kernel(x_ref, w1_ref, w2_ref, pp_ref, gavg_ref, o_ref):
        ppv = pp_ref[...]                                   # (C, 8) f32
        gavg_m = gavg_ref[...]                              # (C, C) f32

        # column masks suppressing the row-wrap of left/right taps in the compact layout
        xcol = jax.lax.broadcasted_iota(jnp.int32, (1, HW), 1) % W
        m_l = (xcol != 0).astype(jnp.bfloat16)              # zero where x == 0
        m_r = (xcol != W - 1).astype(jnp.bfloat16)          # zero where x == W-1
        zpad = jnp.zeros((C, M), jnp.bfloat16)

        def im2col(img_b16):                                # (C, HW) bf16 -> (9C, HW)
            xe = jnp.concatenate([zpad, img_b16, zpad], axis=1)   # (C, HW + 2M)
            taps = []
            for dy in range(3):
                for dx in range(3):
                    off = (dy - 1) * W + (dx - 1)
                    t = xe[:, M + off:M + off + HW]
                    if dx == 0:
                        t = t * m_l
                    elif dx == 2:
                        t = t * m_r
                    taps.append(t)
            return jnp.concatenate(taps, axis=0)

        def gn_relu(acc, gamma, beta):                      # acc: (C, HW) f32
            s1 = jnp.sum(acc, axis=1, keepdims=True)
            s2 = jnp.sum(acc * acc, axis=1, keepdims=True)
            g = jnp.dot(gavg_m, jnp.concatenate([s1, s2], axis=1),
                        preferred_element_type=jnp.float32)      # one tiny matmul per GN
            mean = g[:, 0:1]
            var = g[:, 1:2] - mean * mean
            scale = gamma * jax.lax.rsqrt(var + eps)
            shift = beta - mean * scale
            return jnp.maximum(acc * scale + shift, 0.0)

        # ---- conv1: one K=9C bf16 matmul over the whole B-image lane slab ----
        patch1 = jnp.concatenate(
            [im2col(x_ref[b].astype(jnp.bfloat16)) for b in range(B)], axis=1)  # (9C, B*HW)
        acc1 = jnp.dot(w1_ref[...], patch1,
                       preferred_element_type=jnp.float32) + ppv[:, 0:1]

        # ---- GN1 + ReLU per image, then conv2 over the batched slab ----
        y1 = [gn_relu(acc1[:, b * HW:(b + 1) * HW], ppv[:, 1:2], ppv[:, 2:3])
              for b in range(B)]
        patch2 = jnp.concatenate([im2col(y.astype(jnp.bfloat16)) for y in y1], axis=1)
        acc2 = jnp.dot(w2_ref[...], patch2,
                       preferred_element_type=jnp.float32) + ppv[:, 3:4]

        # ---- GN2 + ReLU, residual add (f32 input), final ReLU, lane-dense store ----
        for b in range(B):
            y2 = gn_relu(acc2[:, b * HW:(b + 1) * HW], ppv[:, 4:5], ppv[:, 5:6])
            o_ref[b] = jnp.maximum(x_ref[b] + y2, 0.0)

    const2 = lambda n: (0, 0)
    grid_spec = pltpu.PrefetchScalarGridSpec(
        num_scalar_prefetch=0,
        grid=(N // B,),                                     # >= 2 steps when N >= 2
        in_specs=[
            pl.BlockSpec((B, C, HW), lambda n: (n, 0, 0)),
            pl.BlockSpec((C, 9 * C), const2),
            pl.BlockSpec((C, 9 * C), const2),
            pl.BlockSpec((C, 8), const2),
            pl.BlockSpec((C, C), const2),
        ],
        out_specs=pl.BlockSpec((B, C, HW), lambda n: (n, 0, 0)),
    )
    out_flat = pl.pallas_call(
        kernel,
        out_shape=jax.ShapeDtypeStruct((N, C, HW), jnp.float32),
        grid_spec=grid_spec,
        compiler_params=pltpu.CompilerParams(
            dimension_semantics=("parallel",),              # image blocks independent
            vmem_limit_bytes=32 * 1024 * 1024,
        ),
    )(x_flat, w1t, w2t, pp, gavg)

    return out_flat.reshape(N, C, H, W)                     # metadata-only reshape


def ref_forward(x, params, num_groups, eps=1e-5):
    """Plain-JAX NCHW reference matching the PyTorch module semantics (f32 everywhere)."""
    def conv(x, w, b):
        y = jax.lax.conv_general_dilated(
            x, w, window_strides=(1, 1), padding="SAME",
            dimension_numbers=("NCHW", "OIHW", "NCHW"))
        return y + b.reshape(1, -1, 1, 1)

    def gn(y, gamma, beta):
        N, C, H, W = y.shape
        cg = C // num_groups
        yr = y.reshape(N, num_groups, cg, H, W)
        mu = jnp.mean(yr, axis=(2, 3, 4), keepdims=True)
        var = jnp.mean((yr - mu) ** 2, axis=(2, 3, 4), keepdims=True)
        yn = ((yr - mu) * jax.lax.rsqrt(var + eps)).reshape(N, C, H, W)
        return yn * gamma.reshape(1, -1, 1, 1) + beta.reshape(1, -1, 1, 1)

    y = jax.nn.relu(gn(conv(x, params["w1"], params["b1"]), params["g1"], params["be1"]))
    y = jax.nn.relu(gn(conv(y, params["w2"], params["b2"]), params["g2"], params["be2"]))
    return jax.nn.relu(x + y)


if __name__ == "__main__":
    # in_planes = planes = 16  ->  num_groups = 16 // 8 = 2 (as in the PyTorch module)
    N, C, H, W = 2, 16, 16, 16
    num_groups = C // 8

    key = jax.random.PRNGKey(0)
    ks = jax.random.split(key, 9)
    params = {
        "w1": 0.1 * jax.random.normal(ks[0], (C, C, 3, 3), jnp.float32),   # OIHW
        "b1": 0.1 * jax.random.normal(ks[1], (C,), jnp.float32),
        "g1": 1.0 + 0.1 * jax.random.normal(ks[2], (C,), jnp.float32),
        "be1": 0.1 * jax.random.normal(ks[3], (C,), jnp.float32),
        "w2": 0.1 * jax.random.normal(ks[4], (C, C, 3, 3), jnp.float32),
        "b2": 0.1 * jax.random.normal(ks[5], (C,), jnp.float32),
        "g2": 1.0 + 0.1 * jax.random.normal(ks[6], (C,), jnp.float32),
        "be2": 0.1 * jax.random.normal(ks[7], (C,), jnp.float32),
    }
    x = jax.random.normal(ks[8], (N, C, H, W), jnp.float32)

    out = jax.block_until_ready(residual_block_forward(x, params, num_groups=num_groups))
    ref = jax.block_until_ready(ref_forward(x, params, num_groups))

    assert out.shape == (N, C, H, W)
    max_err = float(jnp.max(jnp.abs(out - ref)))
    # bf16 matmul operands (f32 accumulation / GN / residual) -> loosened tolerance.
    assert jnp.allclose(out, ref, atol=5e-2, rtol=5e-2), f"max abs err = {max_err}"
    print("KERNEL_OK")
</pallas_src>

<mosaic_0001>
module attributes {stable_mosaic.version = 11 : i64} {
  func.func @kernel(%arg0: i32, %arg1: memref<1x16x256xf32, #tpu.memory_space<vmem>>, %arg2: memref<16x144xbf16, #tpu.memory_space<vmem>>, %arg3: memref<16x144xbf16, #tpu.memory_space<vmem>>, %arg4: memref<16x8xf32, #tpu.memory_space<vmem>>, %arg5: memref<16x16xf32, #tpu.memory_space<vmem>>, %arg6: memref<1x16x256xf32, #tpu.memory_space<vmem>>) attributes {dimension_semantics = [#tpu.dimension_semantics<parallel>], iteration_bounds = array<i64: 2>, scalar_prefetch = 0 : i64, scratch_operands = 0 : i64, tpu.core_type = #tpu.core_type<tc>, window_params = [{transform_indices = @transform_0, window_bounds = array<i64: 1, 16, 256>}, {pipeline_mode = #tpu.pipeline_mode<synchronous>, transform_indices = @transform_1, window_bounds = array<i64: 16, 144>}, {pipeline_mode = #tpu.pipeline_mode<synchronous>, transform_indices = @transform_2, window_bounds = array<i64: 16, 144>}, {pipeline_mode = #tpu.pipeline_mode<synchronous>, transform_indices = @transform_3, window_bounds = array<i64: 16, 8>}, {pipeline_mode = #tpu.pipeline_mode<synchronous>, transform_indices = @transform_4, window_bounds = array<i64: 16, 16>}, {transform_indices = @transform_5, window_bounds = array<i64: 1, 16, 256>}]} {
    %c0 = arith.constant 0 : index
    %c0_0 = arith.constant 0 : index
    %0 = vector.load %arg4[%c0, %c0_0] : memref<16x8xf32, #tpu.memory_space<vmem>>, vector<16x8xf32>
    %c0_1 = arith.constant 0 : index
    %c0_2 = arith.constant 0 : index
    %1 = vector.load %arg5[%c0_1, %c0_2] : memref<16x16xf32, #tpu.memory_space<vmem>>, vector<16x16xf32>
    %2 = tpu.iota {dimensions = array<i32: 1>} : vector<1x256xi32>
    %c16_i32 = arith.constant 16 : i32
    %c0_i32 = arith.constant 0 : i32
    %3 = arith.cmpi eq, %c16_i32, %c0_i32 : i32
    %c1_i32 = arith.constant 1 : i32
    %4 = arith.select %3, %c1_i32, %c16_i32 : i32
    %5 = vector.broadcast %4 : i32 to vector<1x256xi32>
    %6 = arith.remsi %2, %5 : vector<1x256xi32>
    %c0_i32_3 = arith.constant 0 : i32
    %7 = vector.broadcast %c0_i32_3 : i32 to vector<1x256xi32>
    %8 = arith.cmpi ne, %6, %7 : vector<1x256xi32>
    %c0_i32_4 = arith.constant 0 : i32
    %9 = vector.broadcast %c0_i32_4 : i32 to vector<1x256xi32>
    %10 = arith.cmpi slt, %6, %9 : vector<1x256xi32>
    %c0_i32_5 = arith.constant 0 : i32
    %11 = arith.cmpi slt, %4, %c0_i32_5 : i32
    %12 = vector.broadcast %11 : i1 to vector<1x256xi1>
    %13 = vector.broadcast %12 : vector<1x256xi1> to vector<1x256xi1>
    %14 = arith.xori %10, %13 : vector<1x256xi1>
    %15 = arith.andi %14, %8 : vector<1x256xi1>
    %16 = vector.broadcast %4 : i32 to vector<1x256xi32>
    %17 = arith.addi %6, %16 : vector<1x256xi32>
    %18 = arith.select %15, %17, %6 : vector<1x256xi1>, vector<1x256xi32>
    %c0_i32_6 = arith.constant 0 : i32
    %19 = vector.broadcast %c0_i32_6 : i32 to vector<1x256xi32>
    %20 = arith.cmpi ne, %18, %19 : vector<1x256xi32>
    %21 = arith.extui %20 : vector<1x256xi1> to vector<1x256xi32>
    %22 = arith.sitofp %21 : vector<1x256xi32> to vector<1x256xf32>
    %23 = arith.truncf %22 : vector<1x256xf32> to vector<1x256xbf16>
    %c15_i32 = arith.constant 15 : i32
    %24 = vector.broadcast %c15_i32 : i32 to vector<1x256xi32>
    %25 = arith.cmpi ne, %18, %24 : vector<1x256xi32>
    %26 = arith.extui %25 : vector<1x256xi1> to vector<1x256xi32>
    %27 = arith.sitofp %26 : vector<1x256xi32> to vector<1x256xf32>
    %28 = arith.truncf %27 : vector<1x256xf32> to vector<1x256xbf16>
    %cst = arith.constant 0.000000e+00 : bf16
    %29 = vector.broadcast %cst : bf16 to vector<16x17xbf16>
    %c0_7 = arith.constant 0 : index
    %c0_8 = arith.constant 0 : index
    %c0_9 = arith.constant 0 : index
    %30 = vector.load %arg1[%c0_7, %c0_8, %c0_9] : memref<1x16x256xf32, #tpu.memory_space<vmem>>, vector<1x16x256xf32>
    %31 = vector.shape_cast %30 : vector<1x16x256xf32> to vector<16x256xf32>
    %32 = arith.truncf %31 : vector<16x256xf32> to vector<16x256xbf16>
    %33 = tpu.concatenate %29, %32, %29 in 1 : vector<16x17xbf16>, vector<16x256xbf16>, vector<16x17xbf16> -> vector<16x290xbf16>
    %34 = vector.extract_strided_slice %33 {offsets = [0, 0], sizes = [16, 256], strides = [1, 1]} : vector<16x290xbf16> to vector<16x256xbf16>
    %35 = vector.broadcast %23 : vector<1x256xbf16> to vector<16x256xbf16>
    %36 = arith.mulf %34, %35 : vector<16x256xbf16>
    %37 = vector.extract_strided_slice %33 {offsets = [0, 1], sizes = [16, 256], strides = [1, 1]} : vector<16x290xbf16> to vector<16x256xbf16>
    %38 = vector.extract_strided_slice %33 {offsets = [0, 2], sizes = [16, 256], strides = [1, 1]} : vector<16x290xbf16> to vector<16x256xbf16>
    %39 = vector.broadcast %28 : vector<1x256xbf16> to vector<16x256xbf16>
    %40 = arith.mulf %38, %39 : vector<16x256xbf16>
    %41 = vector.extract_strided_slice %33 {offsets = [0, 16], sizes = [16, 256], strides = [1, 1]} : vector<16x290xbf16> to vector<16x256xbf16>
    %42 = vector.broadcast %23 : vector<1x256xbf16> to vector<16x256xbf16>
    %43 = arith.mulf %41, %42 : vector<16x256xbf16>
    %44 = vector.extract_strided_slice %33 {offsets = [0, 17], sizes = [16, 256], strides = [1, 1]} : vector<16x290xbf16> to vector<16x256xbf16>
    %45 = vector.extract_strided_slice %33 {offsets = [0, 18], sizes = [16, 256], strides = [1, 1]} : vector<16x290xbf16> to vector<16x256xbf16>
    %46 = vector.broadcast %28 : vector<1x256xbf16> to vector<16x256xbf16>
    %47 = arith.mulf %45, %46 : vector<16x256xbf16>
    %48 = vector.extract_strided_slice %33 {offsets = [0, 32], sizes = [16, 256], strides = [1, 1]} : vector<16x290xbf16> to vector<16x256xbf16>
    %49 = vector.broadcast %23 : vector<1x256xbf16> to vector<16x256xbf16>
    %50 = arith.mulf %48, %49 : vector<16x256xbf16>
    %51 = vector.extract_strided_slice %33 {offsets = [0, 33], sizes = [16, 256], strides = [1, 1]} : vector<16x290xbf16> to vector<16x256xbf16>
    %52 = vector.extract_strided_slice %33 {offsets = [0, 34], sizes = [16, 256], strides = [1, 1]} : vector<16x290xbf16> to vector<16x256xbf16>
    %53 = vector.broadcast %28 : vector<1x256xbf16> to vector<16x256xbf16>
    %54 = arith.mulf %52, %53 : vector<16x256xbf16>
    %55 = tpu.concatenate %36, %37, %40, %43, %44, %47, %50, %51, %54 in 0 : vector<16x256xbf16>, vector<16x256xbf16>, vector<16x256xbf16>, vector<16x256xbf16>, vector<16x256xbf16>, vector<16x256xbf16>, vector<16x256xbf16>, vector<16x256xbf16>, vector<16x256xbf16> -> vector<144x256xbf16>
    %c0_10 = arith.constant 0 : index
    %c0_11 = arith.constant 0 : index
    %56 = vector.load %arg2[%c0_10, %c0_11] : memref<16x144xbf16, #tpu.memory_space<vmem>>, vector<16x144xbf16>
    %cst_12 = arith.constant dense<0.000000e+00> : vector<16x256xf32>
    %57 = tpu.matmul %56, %55, %cst_12 {dimension_numbers = #tpu.dot_dimension_numbers<[1], [0], [0], [1], [0, 0, 1, 1], [], []>} : vector<16x144xbf16>, vector<144x256xbf16>, vector<16x256xf32> -> vector<16x256xf32>
    %58 = vector.extract_strided_slice %0 {offsets = [0, 0], sizes = [16, 1], strides = [1, 1]} : vector<16x8xf32> to vector<16x1xf32>
    %59 = vector.broadcast %58 : vector<16x1xf32> to vector<16x256xf32>
    %60 = arith.addf %57, %59 : vector<16x256xf32>
    %61 = vector.extract_strided_slice %0 {offsets = [0, 1], sizes = [16, 1], strides = [1, 1]} : vector<16x8xf32> to vector<16x1xf32>
    %62 = vector.extract_strided_slice %0 {offsets = [0, 2], sizes = [16, 1], strides = [1, 1]} : vector<16x8xf32> to vector<16x1xf32>
    %cst_13 = arith.constant dense<0.000000e+00> : vector<16xf32>
    %63 = vector.multi_reduction <add>, %60, %cst_13 [1] : vector<16x256xf32> to vector<16xf32>
    %64 = vector.shape_cast %63 : vector<16xf32> to vector<16x1xf32>
    %65 = arith.mulf %60, %60 : vector<16x256xf32>
    %cst_14 = arith.constant dense<0.000000e+00> : vector<16xf32>
    %66 = vector.multi_reduction <add>, %65, %cst_14 [1] : vector<16x256xf32> to vector<16xf32>
    %67 = vector.shape_cast %66 : vector<16xf32> to vector<16x1xf32>
    %68 = tpu.concatenate %64, %67 in 1 : vector<16x1xf32>, vector<16x1xf32> -> vector<16x2xf32>
    %cst_15 = arith.constant dense<0.000000e+00> : vector<16x2xf32>
    %69 = tpu.matmul %1, %68, %cst_15 {dimension_numbers = #tpu.dot_dimension_numbers<[1], [0], [0], [1], [0, 0, 1, 1], [], []>} : vector<16x16xf32>, vector<16x2xf32>, vector<16x2xf32> -> vector<16x2xf32>
    %70 = vector.extract_strided_slice %69 {offsets = [0, 0], sizes = [16, 1], strides = [1, 1]} : vector<16x2xf32> to vector<16x1xf32>
    %71 = vector.extract_strided_slice %69 {offsets = [0, 1], sizes = [16, 1], strides = [1, 1]} : vector<16x2xf32> to vector<16x1xf32>
    %72 = arith.mulf %70, %70 : vector<16x1xf32>
    %73 = arith.subf %71, %72 : vector<16x1xf32>
    %cst_16 = arith.constant 9.99999974E-6 : f32
    %74 = vector.broadcast %cst_16 : f32 to vector<16x1xf32>
    %75 = arith.addf %73, %74 : vector<16x1xf32>
    %76 = math.rsqrt %75 : vector<16x1xf32>
    %77 = arith.mulf %61, %76 : vector<16x1xf32>
    %78 = arith.mulf %70, %77 : vector<16x1xf32>
    %79 = arith.subf %62, %78 : vector<16x1xf32>
    %80 = vector.broadcast %77 : vector<16x1xf32> to vector<16x256xf32>
    %81 = arith.mulf %60, %80 : vector<16x256xf32>
    %82 = vector.broadcast %79 : vector<16x1xf32> to vector<16x256xf32>
    %83 = arith.addf %81, %82 : vector<16x256xf32>
    %cst_17 = arith.constant 0.000000e+00 : f32
    %84 = vector.broadcast %cst_17 : f32 to vector<16x256xf32>
    %85 = arith.maximumf %83, %84 : vector<16x256xf32>
    %86 = arith.truncf %85 : vector<16x256xf32> to vector<16x256xbf16>
    %87 = tpu.concatenate %29, %86, %29 in 1 : vector<16x17xbf16>, vector<16x256xbf16>, vector<16x17xbf16> -> vector<16x290xbf16>
    %88 = vector.extract_strided_slice %87 {offsets = [0, 0], sizes = [16, 256], strides = [1, 1]} : vector<16x290xbf16> to vector<16x256xbf16>
    %89 = vector.broadcast %23 : vector<1x256xbf16> to vector<16x256xbf16>
    %90 = arith.mulf %88, %89 : vector<16x256xbf16>
    %91 = vector.extract_strided_slice %87 {offsets = [0, 1], sizes = [16, 256], strides = [1, 1]} : vector<16x290xbf16> to vector<16x256xbf16>
    %92 = vector.extract_strided_slice %87 {offsets = [0, 2], sizes = [16, 256], strides = [1, 1]} : vector<16x290xbf16> to vector<16x256xbf16>
    %93 = vector.broadcast %28 : vector<1x256xbf16> to vector<16x256xbf16>
    %94 = arith.mulf %92, %93 : vector<16x256xbf16>
    %95 = vector.extract_strided_slice %87 {offsets = [0, 16], sizes = [16, 256], strides = [1, 1]} : vector<16x290xbf16> to vector<16x256xbf16>
    %96 = vector.broadcast %23 : vector<1x256xbf16> to vector<16x256xbf16>
    %97 = arith.mulf %95, %96 : vector<16x256xbf16>
    %98 = vector.extract_strided_slice %87 {offsets = [0, 17], sizes = [16, 256], strides = [1, 1]} : vector<16x290xbf16> to vector<16x256xbf16>
    %99 = vector.extract_strided_slice %87 {offsets = [0, 18], sizes = [16, 256], strides = [1, 1]} : vector<16x290xbf16> to vector<16x256xbf16>
    %100 = vector.broadcast %28 : vector<1x256xbf16> to vector<16x256xbf16>
    %101 = arith.mulf %99, %100 : vector<16x256xbf16>
    %102 = vector.extract_strided_slice %87 {offsets = [0, 32], sizes = [16, 256], strides = [1, 1]} : vector<16x290xbf16> to vector<16x256xbf16>
    %103 = vector.broadcast %23 : vector<1x256xbf16> to vector<16x256xbf16>
    %104 = arith.mulf %102, %103 : vector<16x256xbf16>
    %105 = vector.extract_strided_slice %87 {offsets = [0, 33], sizes = [16, 256], strides = [1, 1]} : vector<16x290xbf16> to vector<16x256xbf16>
    %106 = vector.extract_strided_slice %87 {offsets = [0, 34], sizes = [16, 256], strides = [1, 1]} : vector<16x290xbf16> to vector<16x256xbf16>
    %107 = vector.broadcast %28 : vector<1x256xbf16> to vector<16x256xbf16>
    %108 = arith.mulf %106, %107 : vector<16x256xbf16>
    %109 = tpu.concatenate %90, %91, %94, %97, %98, %101, %104, %105, %108 in 0 : vector<16x256xbf16>, vector<16x256xbf16>, vector<16x256xbf16>, vector<16x256xbf16>, vector<16x256xbf16>, vector<16x256xbf16>, vector<16x256xbf16>, vector<16x256xbf16>, vector<16x256xbf16> -> vector<144x256xbf16>
    %c0_18 = arith.constant 0 : index
    %c0_19 = arith.constant 0 : index
    %110 = vector.load %arg3[%c0_18, %c0_19] : memref<16x144xbf16, #tpu.memory_space<vmem>>, vector<16x144xbf16>
    %cst_20 = arith.constant dense<0.000000e+00> : vector<16x256xf32>
    %111 = tpu.matmul %110, %109, %cst_20 {dimension_numbers = #tpu.dot_dimension_numbers<[1], [0], [0], [1], [0, 0, 1, 1], [], []>} : vector<16x144xbf16>, vector<144x256xbf16>, vector<16x256xf32> -> vector<16x256xf32>
    %112 = vector.extract_strided_slice %0 {offsets = [0, 3], sizes = [16, 1], strides = [1, 1]} : vector<16x8xf32> to vector<16x1xf32>
    %113 = vector.broadcast %112 : vector<16x1xf32> to vector<16x256xf32>
    %114 = arith.addf %111, %113 : vector<16x256xf32>
    %115 = vector.extract_strided_slice %0 {offsets = [0, 4], sizes = [16, 1], strides = [1, 1]} : vector<16x8xf32> to vector<16x1xf32>
    %116 = vector.extract_strided_slice %0 {offsets = [0, 5], sizes = [16, 1], strides = [1, 1]} : vector<16x8xf32> to vector<16x1xf32>
    %cst_21 = arith.constant dense<0.000000e+00> : vector<16xf32>
    %117 = vector.multi_reduction <add>, %114, %cst_21 [1] : vector<16x256xf32> to vector<16xf32>
    %118 = vector.shape_cast %117 : vector<16xf32> to vector<16x1xf32>
    %119 = arith.mulf %114, %114 : vector<16x256xf32>
    %cst_22 = arith.constant dense<0.000000e+00> : vector<16xf32>
    %120 = vector.multi_reduction <add>, %119, %cst_22 [1] : vector<16x256xf32> to vector<16xf32>
    %121 = vector.shape_cast %120 : vector<16xf32> to vector<16x1xf32>
    %122 = tpu.concatenate %118, %121 in 1 : vector<16x1xf32>, vector<16x1xf32> -> vector<16x2xf32>
    %cst_23 = arith.constant dense<0.000000e+00> : vector<16x2xf32>
    %123 = tpu.matmul %1, %122, %cst_23 {dimension_numbers = #tpu.dot_dimension_numbers<[1], [0], [0], [1], [0, 0, 1, 1], [], []>} : vector<16x16xf32>, vector<16x2xf32>, vector<16x2xf32> -> vector<16x2xf32>
    %124 = vector.extract_strided_slice %123 {offsets = [0, 0], sizes = [16, 1], strides = [1, 1]} : vector<16x2xf32> to vector<16x1xf32>
    %125 = vector.extract_strided_slice %123 {offsets = [0, 1], sizes = [16, 1], strides = [1, 1]} : vector<16x2xf32> to vector<16x1xf32>
    %126 = arith.mulf %124, %124 : vector<16x1xf32>
    %127 = arith.subf %125, %126 : vector<16x1xf32>
    %cst_24 = arith.constant 9.99999974E-6 : f32
    %128 = vector.broadcast %cst_24 : f32 to vector<16x1xf32>
    %129 = arith.addf %127, %128 : vector<16x1xf32>
    %130 = math.rsqrt %129 : vector<16x1xf32>
    %131 = arith.mulf %115, %130 : vector<16x1xf32>
    %132 = arith.mulf %124, %131 : vector<16x1xf32>
    %133 = arith.subf %116, %132 : vector<16x1xf32>
    %134 = vector.broadcast %131 : vector<16x1xf32> to vector<16x256xf32>
    %135 = arith.mulf %114, %134 : vector<16x256xf32>
    %136 = vector.broadcast %133 : vector<16x1xf32> to vector<16x256xf32>
    %137 = arith.addf %135, %136 : vector<16x256xf32>
    %cst_25 = arith.constant 0.000000e+00 : f32
    %138 = vector.broadcast %cst_25 : f32 to vector<16x256xf32>
    %139 = arith.maximumf %137, %138 : vector<16x256xf32>
    %c0_26 = arith.constant 0 : index
    %c0_27 = arith.constant 0 : index
    %c0_28 = arith.constant 0 : index
    %140 = vector.load %arg1[%c0_26, %c0_27, %c0_28] : memref<1x16x256xf32, #tpu.memory_space<vmem>>, vector<1x16x256xf32>
    %141 = vector.shape_cast %140 : vector<1x16x256xf32> to vector<16x256xf32>
    %142 = arith.addf %141, %139 : vector<16x256xf32>
    %cst_29 = arith.constant 0.000000e+00 : f32
    %143 = vector.broadcast %cst_29 : f32 to vector<16x256xf32>
    %144 = arith.maximumf %142, %143 : vector<16x256xf32>
    %c0_30 = arith.constant 0 : index
    %c0_31 = arith.constant 0 : index
    %c0_32 = arith.constant 0 : index
    %145 = vector.load %arg6[%c0_30, %c0_31, %c0_32] : memref<1x16x256xf32, #tpu.memory_space<vmem>>, vector<1x16x256xf32>
    %146 = vector.shape_cast %145 : vector<1x16x256xf32> to vector<16x256xf32>
    %147 = vector.shape_cast %144 : vector<16x256xf32> to vector<1x16x256xf32>
    tpu.vector_store %arg6[%c0_30, %c0_31, %c0_32], %147 {strides = array<i32>} : memref<1x16x256xf32, #tpu.memory_space<vmem>>, vector<1x16x256xf32>,
    return
  }
  func.func @transform_0(%arg0: i32) -> (i32, i32, i32) {
    %c0_i32 = arith.constant 0 : i32
    %c0_i32_0 = arith.constant 0 : i32
    %c0_i32_1 = arith.constant 0 : i32
    return %arg0, %c0_i32, %c0_i32_0 : i32, i32, i32
  }
  func.func @transform_1(%arg0: i32) -> (i32, i32) {
    %c0_i32 = arith.constant 0 : i32
    %c0_i32_0 = arith.constant 0 : i32
    %c0_i32_1 = arith.constant 0 : i32
    return %c0_i32, %c0_i32_0 : i32, i32
  }
  func.func @transform_2(%arg0: i32) -> (i32, i32) {
    %c0_i32 = arith.constant 0 : i32
    %c0_i32_0 = arith.constant 0 : i32
    %c0_i32_1 = arith.constant 0 : i32
    return %c0_i32, %c0_i32_0 : i32, i32
  }
  func.func @transform_3(%arg0: i32) -> (i32, i32) {
    %c0_i32 = arith.constant 0 : i32
    %c0_i32_0 = arith.constant 0 : i32
    %c0_i32_1 = arith.constant 0 : i32
    return %c0_i32, %c0_i32_0 : i32, i32
  }
  func.func @transform_4(%arg0: i32) -> (i32, i32) {
    %c0_i32 = arith.constant 0 : i32
    %c0_i32_0 = arith.constant 0 : i32
    %c0_i32_1 = arith.constant 0 : i32
    return %c0_i32, %c0_i32_0 : i32, i32
  }
  func.func @transform_5(%arg0: i32) -> (i32, i32, i32) {
    %c0_i32 = arith.constant 0 : i32
    %c0_i32_0 = arith.constant 0 : i32
    %c0_i32_1 = arith.constant 0 : i32
    return %arg0, %c0_i32, %c0_i32_0 : i32, i32, i32
  }
}

</mosaic_0001>

<bundles_post_ra>
// kernel: residual_block_forward.1
= control target key start
LH: loop header
LB: loop body
LE: loop exit
PB: predicated region body
PF: predicated region fallthrough
CT: control target
= control target key end

     0   :  { %s1304_s18 = smov 0   ;;  %s1683_s0 = inlined_call_operand.vmem [shape: f32[2,16,256], index: 0, kind: input, shape index: {}]   ;;  %s1684_s1 = inlined_call_operand.vmem [shape: bf16[16,144], index: 1, kind: input, shape index: {}]   ;;  %s1685_s2 = inlined_call_operand.vmem [shape: bf16[16,144], index: 2, kind: input, shape index: {}]   ;;  %s1686_s3 = inlined_call_operand.vmem [shape: f32[16,8], index: 3, kind: input, shape index: {}]   ;;  %s1687_s4 = inlined_call_operand.vmem [shape: f32[16,16], index: 4, kind: input, shape index: {}]   ;;  %s1688_s5 = inlined_call_operand.vmem [shape: f32[2,16,256], index: 5, kind: output, shape index: {}]  }
   0x1 LB: > { %s1134_s19 = sadd.s32 4294967295, %s1247_s18   ;;  %p1138_p0 = scmp.ge.s32.totalorder %s1247_s18, 1  ;;  %s1247_s18 = sphi %s1304_s18, %s15_s18  }
   0x2   : > { %p187_p1 = scmp.lt.s32.totalorder %s1247_s18, 3 }
   0x4   : > { %p188_p2 = pnand %p1138_p0, %p187_p1 }
   0x5   : > { %p215_p3 = scmp.lt.s32.totalorder (!%p188_p2), %s1134_s19, 1  ;;  %s1250_s24 = smov (!%p188_p2), 17  }
   0x6   : > { %191 = sbr.rel (%p188_p2) target bundleno = 2805 (0xaf5), region = 40  ;;  %s1251_s25 = smov (!%p188_p2), 32  }
   0x7   : > { %s1252_s26 = smov (!%p188_p2), 18   ;;  %s1253_s27 = smov (!%p188_p2), 16  }
   0x8   : > { %s1254_s28 = smov (!%p188_p2), 2   ;;  %s1255_s29 = smov (!%p188_p2), 34  }
   0x9   : > { %s1256_s30 = smov (!%p188_p2), 95   ;;  %s1257_s6 = smov (!%p188_p2), 111  }
   0xa   : > { %s1258_s7 = smov (!%p188_p2), 96   ;;  %s1259_s8 = smov (!%p188_p2), 110  }
   0xb   : > { %v230_v0 = vlaneseq  ;;  %s1690_s19 = smov (!%p215_p3, %s1134_s19), 1  ;;  %v1249_v9 = vmov 0.0   ;;  %vm285_vm4 = vcmask 138240   ;;  %vm342_vm5 = vcmask 261120   ;;  %s1260_s9 = smov 112   ;;  %v1464_v57 = vld [vmem:[%s1686_s3] sm:$0xff] }
   0xc   : > { %s1159_s20 = sshll.u32 %s1690_s19, 5  ;;  %vm330_vm6 = vcmask 146432   ;;  %vm318_vm7 = vcmask 130048   ;;  %vm304_vm8 = vcmask 15360   ;;  %s1261_s10 = smov 126   ;;  %vm354_vm9 = vcmask 277504  }
   0xd   : > { %v231_v1 = vand.u32 127, %v230_v0  ;;  %s219_s23 = scalar_lea.vmem %s1683_s0, %s1159_s20  ;;  %s1262_s11 = smov 127   ;;  %v1229_v52 = vld [vmem:[%s1684_s1 + $0x4] ss:$8 sps:$4 sm:$0xff]   ;;  %v1264_v54 = vmov 0   ;;  %vm448_vm10 = vcmask 777216  }
   0xe   : > { %v1320_v4 = vld [vmem:[%s219_s23] sm:$0xff]  ;;  %v1322_v5 = vld [vmem:[%s219_s23 + $0x10] sm:$0xff]  ;;  %v1324_v6 = vld [vmem:[%s219_s23 + $0x8] sm:$0xff]  ;;  %1149 = vmatprep.mubr.msk.bf16.mxu0 %vm318_vm7, %v1229_v52  ;;  %s1263_s14 = smov 94   ;;  %1217 = vset.pattern.permute.xlu1 %v1264_v54  ;;  %vm437_vm11 = vcmask 785408   ;;  %vm423_vm12 = vcmask 900096   ;;  %s224_s13 = scalar_lea.vmem %s1688_s5, %s1159_s20 }
   0xf   : > { %v237_v2 = vand.u32 15, %v231_v1  ;;  %v232_v3 = vadd.s32 128, %v231_v1  ;;  %v277_v8 = vpack.c.bf16 %v1322_v5, %v1320_v4  ;;  %v1328_v11 = vld [vmem:[%s219_s23 + $0x18] sm:$0xff]  ;;  %1216 = vset.pattern.permute.xlu0 %v1264_v54  ;;  %v1469_v58 = vld [vmem:[%s1686_s3 + $0x8] sm:$0xff]  ;;  %vm409_vm13 = vcmask 908288   ;;  %s1265_s12 = smov 1  }
  0x10   : > { %v278_v13 = vpack.c.bf16 %v1328_v11, %v1324_v6  ;;  %vm398_vm14 = vcmask 916480   ;;  %vm384_vm15 = vcmask 1031168  }
  0x11   : > { %vm257_vm0 = vcmp.ne.s32.totalorder %v237_v2, 0  ;;  %v244_v7 = vand.u32 15, %v232_v3  ;;  %vm265_vm1 = vcmp.ne.s32.totalorder %v237_v2, 15  ;;  %281 = vrot.lane.b32.xlu0 %v277_v8, %s1250_s24 }
  0x12   : > { %v1143_v10 = vsel %vm257_vm0, 1.0, %v1249_v9  ;;  %v1145_v16 = vsel %vm265_vm1, 1.0, %v1249_v9  ;;  %vm370_vm0 = vcmask 1039360   ;;  %vm462_vm1 = vcmask 769024  }
  0x13   : > { %v1330_v12 = vpack.c.bf16 %v1143_v10, %v1143_v10  ;;  %vm258_vm2 = vcmp.ne.s32.totalorder %v244_v7, 0  ;;  %vm266_vm3 = vcmp.ne.s32.totalorder %v244_v7, 15  ;;  %v271_v18 = vpack.c.bf16 %v1145_v16, %v1145_v16 }
  0x14   : > { %v1144_v14 = vsel %vm258_vm2, 1.0, %v1249_v9  ;;  %v1146_v17 = vsel %vm266_vm3, 1.0, %v1249_v9  ;;  %vm551_vm2 = vcmask 7168  }
  0x15   : > { %338 = vrot.lane.b32.xlu1 %v1330_v12, %s1251_s25  ;;  %v1336_v15 = vpack.c.bf16 %v1144_v14, %v1144_v14  ;;  %283 = vrot.lane.b32.xlu0 %v278_v13, %s1250_s24  ;;  %v272_v19 = vpack.c.bf16 %v1146_v17, %v1146_v17 }
  0x19   : > { %340 = vrot.lane.b32.xlu1 %v1336_v15, %s1251_s25  ;;  %326 = vrot.lane.b32.xlu0 %v271_v18, %s1252_s26 }
  0x1d   : > { %328 = vrot.lane.b32.xlu1 %v272_v19, %s1252_s26  ;;  %314 = vrot.lane.b32.xlu0 %v1330_v12, %s1253_s27 }
  0x21   : > { %316 = vrot.lane.b32.xlu1 %v1336_v15, %s1253_s27  ;;  %300 = vrot.lane.b32.xlu0 %v271_v18, %s1254_s28 }
  0x25   : > { %302 = vrot.lane.b32.xlu1 %v272_v19, %s1254_s28  ;;  %350 = vrot.lane.b32.xlu0 %v271_v18, %s1255_s29 }
  0x29   : > { %352 = vrot.lane.b32.xlu1 %v272_v19, %s1255_s29 }
  0x83   : > { %v282_v20 = vpop.permute.xlu0 %281 }
  0x84   : > { %v1359_v26 = vsel %vm285_vm4, 0, %v282_v20 }
  0x87   : > { %v1344_v21 = vpop.permute.xlu1 %338  ;;  %v284_v22 = vpop.permute.xlu0 %283 }
  0x88   : > { %v1347_v23 = vsel %vm285_vm4, %v282_v20, %v284_v22  ;;  %v1350_v24 = vsel %vm285_vm4, %v284_v22, 0  ;;  %v347_v27 = vmul.bf16 %v1344_v21, %v1359_v26 }
  0x89   : > { %446 = vrot.lane.b32.xlu1 %v1350_v24, %s1256_s30  ;;  %444 = vrot.lane.b32.xlu0 %v1347_v23, %s1256_s30  ;;  %v297_v54 = vmul.bf16 %v1347_v23, %v1336_v15 }
  0x8b   : > { %v1356_v25 = vpop.permute.xlu1 %340  ;;  %v1367_v28 = vpop.permute.xlu0 %326 }
  0x8c   : > { %v335_v30 = vmul.bf16 %v1367_v28, %v1359_v26  ;;  %v1380_v32 = vsel %vm342_vm5, %v1344_v21, %v1356_v25  ;;  %v349_v33 = vmul.bf16 %v1356_v25, %v1350_v24 }
  0x8d   : > { %405 = vrot.lane.b32.xlu1 %v1347_v23, %s1257_s6  ;;  %442 = vrot.lane.b32.xlu0 %v1359_v26, %s1256_s30  ;;  %v348_v34 = vmul.bf16 %v1380_v32, %v1347_v23 }
  0x8f   : > { %v1369_v29 = vpop.permute.xlu1 %328  ;;  %v1394_v36 = vpop.permute.xlu0 %314 }
  0x90   : > { %v337_v31 = vmul.bf16 %v1369_v29, %v1350_v24  ;;  %v1390_v35 = vsel %vm330_vm6, %v1367_v28, %v1369_v29  ;;  %v323_v39 = vmul.bf16 %v1394_v36, %v1359_v26 }
  0x91   : > { %431 = vrot.lane.b32.xlu1 %v347_v27, %s1258_s7  ;;  %407 = vrot.lane.b32.xlu0 %v1350_v24, %s1257_s6  ;;  %v336_v38 = vmul.bf16 %v1390_v35, %v1347_v23 }
  0x93   : > { %v1396_v37 = vpop.permute.xlu1 %316  ;;  %v1412_v42 = vpop.permute.xlu0 %300 }
  0x94   : > { %v325_v40 = vmul.bf16 %v1396_v37, %v1350_v24  ;;  %v1410_v41 = vsel %vm318_vm7, %v1394_v36, %v1396_v37  ;;  %v309_v44 = vmul.bf16 %v1412_v42, %v1359_v26 }
  0x95   : > { %421 = vrot.lane.b32.xlu1 %v337_v31, %s1259_s8  ;;  %417 = vrot.lane.b32.xlu0 %v335_v30, %s1259_s8  ;;  %v324_v45 = vmul.bf16 %v1410_v41, %v1347_v23 }
  0x97   : > { %v1414_v43 = vpop.permute.xlu1 %302  ;;  %v1432_v49 = vpop.permute.xlu0 %350 }
  0x98   : > { %v1424_v46 = vsel %vm304_vm8, %v1412_v42, %v1414_v43  ;;  %v311_v47 = vmul.bf16 %v1414_v43, %v1350_v24  ;;  %v359_v55 = vmul.bf16 %v1432_v49, %v1359_v26 }
  0x99   : > { %433 = vrot.lane.b32.xlu1 %v348_v34, %s1258_s7  ;;  %435 = vrot.lane.b32.xlu0 %v349_v33, %s1258_s7  ;;  %v310_v48 = vmul.bf16 %v1424_v46, %v1347_v23 }
  0x9b   : > { %v1434_v50 = vpop.permute.xlu1 %352 }
  0x9c   : > { %v1440_v51 = vsel %vm354_vm9, %v1432_v49, %v1434_v50  ;;  %v361_v56 = vmul.bf16 %v1434_v50, %v1350_v24 }
  0x9d   : > { %403 = vrot.lane.b32.xlu1 %v1359_v26, %s1257_s6  ;;  %419 = vrot.lane.b32.xlu0 %v336_v38, %s1259_s8  ;;  %v360_v53 = vmul.bf16 %v1440_v51, %v1347_v23 }
  0xa1   : > { %396 = vrot.lane.b32.xlu1 %v325_v40, %s1260_s9  ;;  %392 = vrot.lane.b32.xlu0 %v323_v39, %s1260_s9 }
  0xa5   : > { %394 = vrot.lane.b32.xlu0 %v324_v45, %s1260_s9  ;;  %378 = vrot.lane.b32.xlu1 %v309_v44, %s1261_s10 }
  0xa9   : > { %382 = vrot.lane.b32.xlu0 %v311_v47, %s1261_s10  ;;  %380 = vrot.lane.b32.xlu1 %v310_v48, %s1261_s10 }
  0xad   : > { %366 = vrot.lane.b32.xlu0 %v1347_v23, %s1262_s11  ;;  %368 = vrot.lane.b32.xlu1 %v1350_v24, %s1262_s11 }
  0xb1   : > { %364 = vrot.lane.b32.xlu0 %v1359_v26, %s1262_s11  ;;  %458 = vrot.lane.b32.xlu1 %v360_v53, %s1263_s14 }
  0xb5   : > { %460 = vrot.lane.b32.xlu0 %v361_v56, %s1263_s14  ;;  %456 = vrot.lane.b32.xlu1 %v359_v55, %s1263_s14  ;;  %v296_v56 = vmul.bf16 %v1359_v26, %v1330_v12 }
  0xb9   : > { %471 = vperm.xlu1 %1217, %v1464_v57   ;;  %476 = vperm.xlu0 %1216, %v1469_v58  }
  0xfb   : > { %v447_v59 = vpop.permute.xlu1 %446  ;;  %v445_v60 = vpop.permute.xlu0 %444 }
  0xfc   : > { %v450_v61 = vsel %vm448_vm10, %v445_v60, %v447_v59 }
  0xfd   : > { %492 = vmatprep.subr.bf16.mxu0 %v450_v61 }
  0xff   : > { %v406_v62 = vpop.permute.xlu1 %405  ;;  %v443_v63 = vpop.permute.xlu0 %442 }
 0x100   : > { %v449_v0 = vsel %vm448_vm10, %v443_v63, %v445_v60 }
 0x101   : > { %493 = vmatpush1.bf16.msra.mxu0 %v449_v0 }
 0x103   : > { %v432_v1 = vpop.permute.xlu1 %431  ;;  %v408_v2 = vpop.permute.xlu0 %407 }
 0x104   : > { %v411_v19 = vsel %vm409_vm13, %v406_v62, %v408_v2 }
 0x107   : > { %v422_v3 = vpop.permute.xlu1 %421  ;;  %v418_v7 = vpop.permute.xlu0 %417 }
 0x10b   : > { %v434_v8 = vpop.permute.xlu1 %433  ;;  %v436_v9 = vpop.permute.xlu0 %435 }
 0x10c   : > { %v439_v10 = vsel %vm437_vm11, %v434_v8, %v436_v9  ;;  %v438_v13 = vsel %vm437_vm11, %v432_v1, %v434_v8 }
 0x10d   : > { %494 = vmatprep.subr.bf16.mxu0 %v439_v10 }
 0x10e   : > { %495 = vmatpush1.bf16.msra.mxu0 %v438_v13 }
 0x10f   : > { %v404_v14 = vpop.permute.xlu1 %403  ;;  %v420_v16 = vpop.permute.xlu0 %419 }
 0x110   : > { %v425_v17 = vsel %vm423_vm12, %v420_v16, %v422_v3  ;;  %v424_v18 = vsel %vm423_vm12, %v418_v7, %v420_v16  ;;  %v410_v24 = vsel %vm409_vm13, %v404_v14, %v406_v62  ;;  %v1227_v62 = vld [vmem:[%s1684_s1] ss:$8 sps:$4 sm:$0xff]  }
 0x111   : > { %496 = vmatprep.subr.bf16.mxu0 %v425_v17 }
 0x112   : > { %497 = vmatpush1.bf16.msra.mxu0 %v424_v18 }
 0x113   : > { %v397_v20 = vpop.permute.xlu1 %396  ;;  %498 = vmatprep.subr.bf16.mxu0 %v411_v19  ;;  %v393_v22 = vpop.permute.xlu0 %392 }
 0x116   : > { %499 = vmatpush1.bf16.msra.mxu0 %v410_v24 }
 0x117   : > { %v379_v27 = vpop.permute.xlu1 %378  ;;  %v395_v30 = vpop.permute.xlu0 %394 }
 0x118   : > { %v400_v31 = vsel %vm398_vm14, %v395_v30, %v397_v20  ;;  %v399_v33 = vsel %vm398_vm14, %v393_v22, %v395_v30  ;;  %v228_v22 = vld [vmem:[%s1687_s4] sm:$0xff] }
 0x119   : > { %500 = vmatprep.subr.bf16.mxu0 %v400_v31  ;;  %1173 = vmatprep.mubr.msk.f32.mxu1 %vm318_vm7, %v228_v22 }
 0x11a   : > { %501 = vmatpush1.bf16.msra.mxu0 %v399_v33 }
 0x11b   : > { %v381_v34 = vpop.permute.xlu1 %380  ;;  %v383_v38 = vpop.permute.xlu0 %382 }
 0x11c   : > { %v386_v39 = vsel %vm384_vm15, %v381_v34, %v383_v38  ;;  %v385_v40 = vsel %vm384_vm15, %v379_v27, %v381_v34  ;;  %v1526_v38 = vld [vmem:[%s1687_s4 + $0x8] sm:$0xff] }
 0x11d   : > { %502 = vmatprep.subr.bf16.mxu0 %v386_v39 }
 0x11e   : > { %503 = vmatpush1.bf16.msra.mxu0 %v385_v40 }
 0x11f   : > { %v369_v44 = vpop.permute.xlu1 %368  ;;  %v367_v45 = vpop.permute.xlu0 %366 }
 0x120   : > { %v372_v47 = vsel %vm370_vm0, %v367_v45, %v369_v44 }
 0x121   : > { %504 = vmatprep.subr.bf16.mxu0 %v372_v47 }
 0x123   : > { %v459_v48 = vpop.permute.xlu1 %458  ;;  %v365_v52 = vpop.permute.xlu0 %364 }
 0x124   : > { %v371_v53 = vsel %vm370_vm0, %v365_v52, %v367_v45 }
 0x125   : > { %505 = vmatpush1.bf16.msra.mxu0 %v371_v53 }
 0x126   : > { %506 = vmatprep.subr.bf16.mxu0 %v297_v54 }
 0x127   : > { %v461_v55 = vpop.permute.xlu0 %460  ;;  %v457_v60 = vpop.permute.xlu1 %456 }
 0x128   : > { %v464_v59 = vsel %vm462_vm1, %v459_v48, %v461_v55  ;;  %v463_v61 = vsel %vm462_vm1, %v457_v60, %v459_v48 }
 0x129   : > { %507 = vmatpush1.bf16.msra.mxu0 %v296_v56  ;;  %v1266_v56 = vmov 1  }
 0x12a   : > { %522 = vmatprep.subr.bf16.mxu0 %v464_v59  ;;  %1219 = vset.pattern.permute.xlu0 %v1266_v56 }
 0x12b   : > { %1218 = vset.pattern.permute.xlu1 %v1266_v56 }
 0x12d   : > { %523 = vmatpush2.bf16.msra.mxu0 %v463_v61 }
 0x130   : > { %525 = vmatmul.mubr.bf16.vlgmr.msra.gmra.mxu0 %v1227_v62 }
 0x131   : > { %1180 = vmatprep.mubr.msk.f32.mxu0 %vm318_vm7, %v228_v22 }
 0x134   : > { %v477_v0 = vpop.permute.xlu0 %476  ;;  %v472_v1 = vpop.permute.xlu1 %471 }
 0x1f0   : > { %v526_v23 = vpop.f32.mrf.mxu0 }
 0x1f1   : > { %v1500_v8 = vadd.f32 %v526_v23, %v472_v1 }
 0x1f2   : > { %v528_v63 = vpop.f32.mrf.mxu0 }
 0x1f3   : > { %v1496_v3 = vadd.f32 %v528_v63, %v472_v1  ;;  %v541_v18 = vmul.f32 %v1500_v8, %v1500_v8 }
 0x1f4   : > { %v530_v2 = vpop.f32.mrf.mxu0 }
 0x1f5   : > { %v1498_v26 = vadd.f32 %v530_v2, %v477_v0  ;;  %v542_v16 = vmul.f32 %v1496_v3, %v1496_v3  ;;  %v535_v20 = vadd.f32 %v1496_v3, %v1500_v8  ;;  %v1267_v2 = vmov 2  }
 0x1f6   : > { %v532_v7 = vpop.f32.mrf.mxu0 }
 0x1f7   : > { %v1502_v9 = vadd.f32 %v532_v7, %v477_v0  ;;  %v543_v13 = vmul.f32 %v1498_v26, %v1498_v26  ;;  %v545_v19 = vadd.f32 %v542_v16, %v541_v18 }
 0x1f9   : > { %v538_v10 = vadd.f32 %v1502_v9, %v1498_v26  ;;  %v544_v14 = vmul.f32 %v1502_v9, %v1502_v9 }
 0x1fb   : > { %539 = vadd.xlane.f32.xlu1 %v538_v10  ;;  %v548_v17 = vadd.f32 %v544_v14, %v543_v13 }
 0x1fd   : > { %549 = vadd.xlane.f32.xlu0 %v548_v17 }
 0x1ff   : > { %546 = vadd.xlane.f32.xlu1 %v545_v19 }
 0x201   : > { %536 = vadd.xlane.f32.xlu0 %v535_v20 }
 0x284   : > { %v540_v24 = vpop.xlane.xlu1 %539 }
 0x286   : > { %v550_v27 = vpop.xlane.xlu0 %549 }
 0x287   : > { %v553_v30 = vsel %vm551_vm2, %v540_v24, %v550_v27 }
 0x288   : > { %1169 = vmatprep.subr.mxu1 %v553_v30  ;;  %v547_v31 = vpop.xlane.xlu1 %546 }
 0x289   : > { %1170 = vmatpush3.msra.mxu1 %v553_v30 }
 0x28a   : > { %v537_v33 = vpop.xlane.xlu0 %536 }
 0x28b   : > { %v552_v34 = vsel %vm551_vm2, %v537_v33, %v547_v31 }
 0x28c   : > { %1171 = vmatprep.subr.mxu1 %v552_v34 }
 0x28d   : > { %1172 = vmatpush3.msra.mxu1 %v552_v34 }
 0x28e   : > { %1174 = vmatmul.mubr.msk.f32.vlgmr.msra.gmra.mxu1 %vm318_vm7, %v1526_v38 }
 0x34e   : > { %v1175_v39 = vpop.f32.mrf.mxu1 }
 0x34f   : > { %v636_v40 = vmul.f32 %v1175_v39, %v1175_v39 }
 0x350   : > { %v626_v44 = vpop.f32.mrf.mxu1 }
 0x351   : > { %v635_v45 = vmul.f32 %v626_v44, %v626_v44  ;;  %641 = vrot.lane.b32.xlu1 %v636_v40, %s1265_s12 }
 0x353   : > { %639 = vrot.lane.b32.xlu0 %v635_v45, %s1265_s12 }
 0x3c3   : > { %v642_v47 = vpop.permute.xlu1 %641 }
 0x3c4   : > { %v646_v48 = vsub.f32 %v1175_v39, %v642_v47 }
 0x3c5   : > { %v640_v52 = vpop.permute.xlu0 %639 }
 0x3c6   : > { %v648_v53 = vadd.f32 1e-05, %v646_v48  ;;  %v645_v54 = vsub.f32 %v626_v44, %v640_v52 }
 0x3c8   : > { %1233 = vrsqrt.f32 %v648_v53  ;;  %v647_v55 = vadd.f32 1e-05, %v645_v54 }
 0x3ca   : > { %1235 = vrsqrt.f32 %v647_v55 }
 0x3d5   : > { %v1234_v59 = vpop.eup %1233 }
 0x3d6   : > { %v652_v60 = vmul.f32 %v1234_v59, %v1469_v58 }
 0x3d7   : > { %v1236_v61 = vpop.eup %1235 }
 0x3d8   : > { %657 = vrot.lane.b32.xlu0 %v652_v60, %s1262_s11  ;;  %v651_v62 = vmul.f32 %v1236_v61, %v1464_v57 }
 0x3da   : > { %655 = vrot.lane.b32.xlu1 %v651_v62, %s1262_s11 }
 0x44a   : > { %v658_v23 = vpop.permute.xlu0 %657 }
 0x44b   : > { %v662_v63 = vmul.f32 %v1175_v39, %v658_v23 }
 0x44c   : > { %v656_v0 = vpop.permute.xlu1 %655 }
 0x44d   : > { %v661_v1 = vmul.f32 %v656_v0, %v626_v44  ;;  %667 = vrot.lane.b32.xlu0 %v662_v63, %s1254_s28 }
 0x44f   : > { %665 = vrot.lane.b32.xlu1 %v661_v1, %s1254_s28 }
 0x451   : > { %678 = vperm.xlu0 %1219, %v652_v60  }
 0x453   : > { %674 = vperm.xlu1 %1218, %v651_v62  }
 0x457   : > { %1220 = vset.pattern.permute.xlu1 %v1267_v2 }
 0x4bf   : > { %v668_v13 = vpop.permute.xlu0 %667 }
 0x4c0   : > { %v672_v14 = vsub.f32 %v1469_v58, %v668_v13 }
 0x4c1   : > { %v666_v7 = vpop.permute.xlu1 %665 }
 0x4c2   : > { %v671_v10 = vsub.f32 %v1464_v57, %v666_v7 }
 0x4c4   : > { %687 = vperm.xlu1 %1220, %v671_v10  }
 0x4c8   : > { %692 = vperm.xlu1 %1220, %v672_v14  }
 0x4cc   : > { %v679_v17 = vpop.permute.xlu0 %678 }
 0x4cd   : > { %v683_v22 = vmul.f32 %v679_v17, %v1498_v26  ;;  %v684_v24 = vmul.f32 %v679_v17, %v1502_v9 }
 0x4ce   : > { %v675_v16 = vpop.permute.xlu1 %674 }
 0x4cf   : > { %v681_v19 = vmul.f32 %v675_v16, %v1500_v8  ;;  %v682_v20 = vmul.f32 %v675_v16, %v1496_v3 }
 0x53f   : > { %v688_v18 = vpop.permute.xlu1 %687 }
 0x540   : > { %v695_v27 = vadd.f32 %v688_v18, %v681_v19  ;;  %v696_v30 = vadd.f32 %v688_v18, %v682_v20 }
 0x542   : > { %v699_v39 = vmax.f32 %v695_v27, 0.0  ;;  %v700_v40 = vmax.f32 %v696_v30, 0.0 }
 0x543   : > { %v693_v31 = vpop.permute.xlu1 %692 }
 0x544   : > { %v697_v33 = vadd.f32 %v693_v31, %v683_v22  ;;  %v698_v34 = vadd.f32 %v693_v31, %v684_v24 }
 0x546   : > { %v701_v44 = vmax.f32 %v697_v33, 0.0  ;;  %v702_v45 = vmax.f32 %v698_v34, 0.0 }
 0x548   : > { %v704_v47 = vpack.c.bf16 %v702_v45, %v700_v40  ;;  %v703_v48 = vpack.c.bf16 %v701_v44, %v699_v39 }
 0x54a   : > { %709 = vrot.lane.b32.xlu1 %v704_v47, %s1250_s24  ;;  %707 = vrot.lane.b32.xlu0 %v703_v48, %s1250_s24 }
 0x5bc   : > { %v710_v3 = vpop.permute.xlu1 %709  ;;  %v708_v8 = vpop.permute.xlu0 %707 }
 0x5bd   : > { %v717_v26 = vsel %vm285_vm4, %v710_v3, 0  ;;  %v1548_v9 = vsel %vm285_vm4, %v708_v8, %v710_v3  ;;  %v1554_v52 = vsel %vm285_vm4, 0, %v708_v8 }
 0x5be   : > { %814 = vrot.lane.b32.xlu1 %v717_v26, %s1256_s30  ;;  %812 = vrot.lane.b32.xlu0 %v1548_v9, %s1256_s30  ;;  %v732_v53 = vmul.bf16 %v717_v26, %v1356_v25  ;;  %v731_v54 = vmul.bf16 %v1548_v9, %v1380_v32  ;;  %v730_v55 = vmul.bf16 %v1554_v52, %v1344_v21 }
 0x5bf   : > { %v728_v56 = vmul.bf16 %v1548_v9, %v1390_v35  ;;  %v729_v59 = vmul.bf16 %v717_v26, %v1369_v29  ;;  %v727_v25 = vmul.bf16 %v1554_v52, %v1367_v28  ;;  %v726_v32 = vmul.bf16 %v717_v26, %v1396_v37 }
 0x5c0   : > { %v725_v21 = vmul.bf16 %v1548_v9, %v1410_v41  ;;  %v724_v35 = vmul.bf16 %v1554_v52, %v1394_v36  ;;  %v722_v29 = vmul.bf16 %v1548_v9, %v1424_v46  ;;  %v723_v28 = vmul.bf16 %v717_v26, %v1414_v43  ;;  %v1230_v36 = vld [vmem:[%s1685_s2 + $0x4] ss:$8 sps:$4 sm:$0xff]  }
 0x5c1   : > { %v721_v37 = vmul.bf16 %v1554_v52, %v1412_v42  ;;  %v734_v41 = vmul.bf16 %v1548_v9, %v1440_v51  ;;  %1154 = vmatprep.mubr.msk.bf16.mxu1 %vm318_vm7, %v1230_v36  ;;  %v1268_v42 = vmov 3   ;;  %v735_v43 = vmul.bf16 %v717_v26, %v1434_v50 }
 0x5c2   : > { %776 = vrot.lane.b32.xlu1 %v1548_v9, %s1257_s6  ;;  %810 = vrot.lane.b32.xlu0 %v1554_v52, %s1256_s30  ;;  %v733_v46 = vmul.bf16 %v1554_v52, %v1432_v49 }
 0x5c3   : > { %1222 = vset.pattern.permute.xlu1 %v1268_v42  ;;  %1221 = vset.pattern.permute.xlu0 %v1268_v42 }
 0x5c6   : > { %774 = vrot.lane.b32.xlu1 %v1554_v52, %s1257_s6  ;;  %778 = vrot.lane.b32.xlu0 %v717_v26, %s1257_s6 }
 0x5ca   : > { %804 = vrot.lane.b32.xlu0 %v732_v53, %s1258_s7  ;;  %802 = vrot.lane.b32.xlu1 %v731_v54, %s1258_s7  ;;  %v720_v53 = vmul.bf16 %v1548_v9, %v1336_v15 }
 0x5ce   : > { %800 = vrot.lane.b32.xlu1 %v730_v55, %s1258_s7  ;;  %789 = vrot.lane.b32.xlu0 %v728_v56, %s1259_s8  ;;  %v719_v55 = vmul.bf16 %v1554_v52, %v1330_v12  ;;  %s1269_s7 = smov 3  }
 0x5d2   : > { %791 = vrot.lane.b32.xlu1 %v729_v59, %s1259_s8  ;;  %787 = vrot.lane.b32.xlu0 %v727_v25, %s1259_s8  ;;  %s1271_s8 = smov 124  }
 0x5d6   : > { %768 = vrot.lane.b32.xlu1 %v726_v32, %s1260_s9  ;;  %766 = vrot.lane.b32.xlu0 %v725_v21, %s1260_s9  ;;  %v1232_v32 = vld [vmem:[%s1685_s2] ss:$8 sps:$4 sm:$0xff]  }
 0x5da   : > { %764 = vrot.lane.b32.xlu0 %v724_v35, %s1260_s9  ;;  %753 = vrot.lane.b32.xlu1 %v722_v29, %s1261_s10  ;;  %s1272_s9 = smov 5  }
 0x5de   : > { %755 = vrot.lane.b32.xlu0 %v723_v28, %s1261_s10  ;;  %751 = vrot.lane.b32.xlu1 %v721_v37, %s1261_s10 }
 0x5e2   : > { %740 = vrot.lane.b32.xlu0 %v1548_v9, %s1262_s11  ;;  %742 = vrot.lane.b32.xlu1 %v717_v26, %s1262_s11 }
 0x5e6   : > { %738 = vrot.lane.b32.xlu0 %v1554_v52, %s1262_s11  ;;  %825 = vrot.lane.b32.xlu1 %v734_v41, %s1263_s14 }
 0x5ea   : > { %827 = vrot.lane.b32.xlu0 %v735_v43, %s1263_s14  ;;  %823 = vrot.lane.b32.xlu1 %v733_v46, %s1263_s14 }
 0x5ee   : > { %836 = vperm.xlu1 %1222, %v1464_v57   ;;  %840 = vperm.xlu0 %1221, %v1469_v58  }
 0x630   : > { %v815_v51 = vpop.permute.xlu1 %814  ;;  %v813_v60 = vpop.permute.xlu0 %812 }
 0x631   : > { %v817_v61 = vsel %vm448_vm10, %v813_v60, %v815_v51 }
 0x632   : > { %855 = vmatprep.subr.bf16.mxu1 %v817_v61 }
 0x634   : > { %v777_v62 = vpop.permute.xlu1 %776  ;;  %v811_v23 = vpop.permute.xlu0 %810 }
 0x635   : > { %v816_v50 = vsel %vm448_vm10, %v811_v23, %v813_v60 }
 0x636   : > { %856 = vmatpush1.bf16.msra.mxu1 %v816_v50 }
 0x638   : > { %v775_v63 = vpop.permute.xlu1 %774  ;;  %v779_v49 = vpop.permute.xlu0 %778 }
 0x639   : > { %v781_v19 = vsel %vm409_vm13, %v777_v62, %v779_v49  ;;  %v780_v24 = vsel %vm409_vm13, %v775_v63, %v777_v62 }
 0x63c   : > { %v805_v0 = vpop.permute.xlu0 %804  ;;  %v803_v1 = vpop.permute.xlu1 %802 }
 0x63d   : > { %v807_v2 = vsel %vm437_vm11, %v803_v1, %v805_v0 }
 0x63e   : > { %857 = vmatprep.subr.bf16.mxu1 %v807_v2 }
 0x640   : > { %v801_v7 = vpop.permute.xlu1 %800  ;;  %v790_v10 = vpop.permute.xlu0 %789 }
 0x641   : > { %v806_v13 = vsel %vm437_vm11, %v801_v7, %v803_v1 }
 0x642   : > { %858 = vmatpush1.bf16.msra.mxu1 %v806_v13 }
 0x644   : > { %v792_v14 = vpop.permute.xlu1 %791  ;;  %v788_v16 = vpop.permute.xlu0 %787 }
 0x645   : > { %v793_v17 = vsel %vm423_vm12, %v788_v16, %v790_v10  ;;  %v794_v18 = vsel %vm423_vm12, %v790_v10, %v792_v14 }
 0x646   : > { %859 = vmatprep.subr.bf16.mxu1 %v794_v18 }
 0x647   : > { %860 = vmatpush1.bf16.msra.mxu1 %v793_v17 }
 0x648   : > { %v769_v20 = vpop.permute.xlu1 %768  ;;  %861 = vmatprep.subr.bf16.mxu1 %v781_v19  ;;  %v767_v22 = vpop.permute.xlu0 %766 }
 0x649   : > { %v771_v27 = vsel %vm398_vm14, %v767_v22, %v769_v20 }
 0x64b   : > { %862 = vmatpush1.bf16.msra.mxu1 %v780_v24  ;;  %v1270_v24 = vmov 4  }
 0x64c   : > { %863 = vmatprep.subr.bf16.mxu1 %v771_v27  ;;  %v765_v30 = vpop.permute.xlu0 %764  ;;  %v754_v31 = vpop.permute.xlu1 %753  ;;  %1224 = vset.pattern.permute.xlu0 %v1270_v24 }
 0x64d   : > { %v770_v33 = vsel %vm398_vm14, %v765_v30, %v767_v22  ;;  %1223 = vset.pattern.permute.xlu1 %v1270_v24 }
 0x64f   : > { %864 = vmatpush1.bf16.msra.mxu1 %v770_v33 }
 0x650   : > { %v756_v34 = vpop.permute.xlu0 %755  ;;  %v752_v39 = vpop.permute.xlu1 %751 }
 0x651   : > { %v757_v40 = vsel %vm384_vm15, %v752_v39, %v754_v31  ;;  %v758_v44 = vsel %vm384_vm15, %v754_v31, %v756_v34 }
 0x652   : > { %865 = vmatprep.subr.bf16.mxu1 %v758_v44 }
 0x653   : > { %866 = vmatpush1.bf16.msra.mxu1 %v757_v40 }
 0x654   : > { %v741_v45 = vpop.permute.xlu0 %740  ;;  %v743_v47 = vpop.permute.xlu1 %742 }
 0x655   : > { %v745_v48 = vsel %vm370_vm0, %v741_v45, %v743_v47 }
 0x656   : > { %867 = vmatprep.subr.bf16.mxu1 %v745_v48 }
 0x658   : > { %v739_v3 = vpop.permute.xlu0 %738  ;;  %v826_v8 = vpop.permute.xlu1 %825 }
 0x659   : > { %v744_v26 = vsel %vm370_vm0, %v739_v3, %v741_v45  ;;  %v1273_v45 = vmov 5  }
 0x65a   : > { %868 = vmatpush1.bf16.msra.mxu1 %v744_v26 }
 0x65b   : > { %869 = vmatprep.subr.bf16.mxu1 %v720_v53 }
 0x65c   : > { %v828_v54 = vpop.permute.xlu0 %827  ;;  %v824_v59 = vpop.permute.xlu1 %823 }
 0x65d   : > { %v830_v56 = vsel %vm462_vm1, %v826_v8, %v828_v54  ;;  %v829_v25 = vsel %vm462_vm1, %v824_v59, %v826_v8 }
 0x65e   : > { %870 = vmatpush1.bf16.msra.mxu1 %v719_v55 }
 0x65f   : > { %885 = vmatprep.subr.bf16.mxu1 %v830_v56 }
 0x662   : > { %886 = vmatpush2.bf16.msra.mxu1 %v829_v25 }
 0x665   : > { %888 = vmatmul.mubr.bf16.vlgmr.msra.gmra.mxu1 %v1232_v32 }
 0x669   : > { %v841_v21 = vpop.permute.xlu0 %840  ;;  %v837_v35 = vpop.permute.xlu1 %836 }
 0x725   : > { %v889_v15 = vpop.f32.mrf.mxu1 }
 0x726   : > { %v1641_v37 = vadd.f32 %v889_v15, %v837_v35 }
 0x727   : > { %v891_v9 = vpop.f32.mrf.mxu1 }
 0x728   : > { %v1637_v28 = vadd.f32 %v891_v9, %v837_v35  ;;  %v904_v60 = vmul.f32 %v1641_v37, %v1641_v37 }
 0x729   : > { %v893_v29 = vpop.f32.mrf.mxu1 }
 0x72a   : > { %v1639_v12 = vadd.f32 %v893_v29, %v841_v21  ;;  %v905_v46 = vmul.f32 %v1637_v28, %v1637_v28  ;;  %v898_v62 = vadd.f32 %v1637_v28, %v1641_v37 }
 0x72b   : > { %v895_v52 = vpop.f32.mrf.mxu1 }
 0x72c   : > { %v1643_v36 = vadd.f32 %v895_v52, %v841_v21  ;;  %v906_v42 = vmul.f32 %v1639_v12, %v1639_v12  ;;  %v908_v61 = vadd.f32 %v905_v46, %v904_v60 }
 0x72e   : > { %v901_v41 = vadd.f32 %v1643_v36, %v1639_v12  ;;  %v907_v43 = vmul.f32 %v1643_v36, %v1643_v36 }
 0x730   : > { %902 = vadd.xlane.f32.xlu1 %v901_v41  ;;  %v911_v51 = vadd.f32 %v907_v43, %v906_v42 }
 0x732   : > { %912 = vadd.xlane.f32.xlu0 %v911_v51 }
 0x734   : > { %909 = vadd.xlane.f32.xlu1 %v908_v61 }
 0x736   : > { %899 = vadd.xlane.f32.xlu0 %v898_v62 }
 0x7b9   : > { %v903_v23 = vpop.xlane.xlu1 %902 }
 0x7bb   : > { %v913_v50 = vpop.xlane.xlu0 %912 }
 0x7bc   : > { %v915_v63 = vsel %vm551_vm2, %v903_v23, %v913_v50 }
 0x7bd   : > { %1176 = vmatprep.subr.mxu0 %v915_v63  ;;  %v910_v49 = vpop.xlane.xlu1 %909 }
 0x7be   : > { %1177 = vmatpush3.msra.mxu0 %v915_v63 }
 0x7bf   : > { %v900_v0 = vpop.xlane.xlu0 %899 }
 0x7c0   : > { %v914_v1 = vsel %vm551_vm2, %v900_v0, %v910_v49 }
 0x7c1   : > { %1178 = vmatprep.subr.mxu0 %v914_v1 }
 0x7c2   : > { %1179 = vmatpush3.msra.mxu0 %v914_v1 }
 0x7c3   : > { %1181 = vmatmul.mubr.msk.f32.vlgmr.msra.gmra.mxu0 %vm318_vm7, %v1526_v38 }
 0x883   : > { %v1182_v2 = vpop.f32.mrf.mxu0 }
 0x884   : > { %v992_v7 = vmul.f32 %v1182_v2, %v1182_v2 }
 0x885   : > { %v982_v10 = vpop.f32.mrf.mxu0 }
 0x886   : > { %v991_v13 = vmul.f32 %v982_v10, %v982_v10  ;;  %997 = vrot.lane.b32.xlu1 %v992_v7, %s1265_s12 }
 0x888   : > { %995 = vrot.lane.b32.xlu0 %v991_v13, %s1265_s12 }
 0x8f8   : > { %v998_v14 = vpop.permute.xlu1 %997 }
 0x8f9   : > { %v1002_v16 = vsub.f32 %v1182_v2, %v998_v14 }
 0x8fa   : > { %v996_v17 = vpop.permute.xlu0 %995 }
 0x8fb   : > { %v1004_v18 = vadd.f32 1e-05, %v1002_v16  ;;  %v1001_v19 = vsub.f32 %v982_v10, %v996_v17 }
 0x8fd   : > { %1237 = vrsqrt.f32 %v1004_v18  ;;  %v1003_v20 = vadd.f32 1e-05, %v1001_v19 }
 0x8ff   : > { %1239 = vrsqrt.f32 %v1003_v20 }
 0x90a   : > { %v1238_v22 = vpop.eup %1237 }
 0x90b   : > { %1011 = vrot.lane.b32.xlu0 %v1238_v22, %s1269_s7 }
 0x90c   : > { %v1240_v38 = vpop.eup %1239 }
 0x90d   : > { %1009 = vrot.lane.b32.xlu1 %v1240_v38, %s1269_s7 }
 0x97d   : > { %v1012_v27 = vpop.permute.xlu0 %1011 }
 0x97e   : > { %v1016_v30 = vmul.f32 %v1012_v27, %v1469_v58 }
 0x97f   : > { %v1010_v31 = vpop.permute.xlu1 %1009 }
 0x980   : > { %v1015_v33 = vmul.f32 %v1010_v31, %v1464_v57  ;;  %1021 = vrot.lane.b32.xlu0 %v1016_v30, %s1271_s8 }
 0x982   : > { %1019 = vrot.lane.b32.xlu1 %v1015_v33, %s1271_s8 }
 0x9f2   : > { %v1022_v34 = vpop.permute.xlu0 %1021 }
 0x9f3   : > { %v1026_v39 = vmul.f32 %v1182_v2, %v1022_v34 }
 0x9f4   : > { %v1020_v40 = vpop.permute.xlu1 %1019 }
 0x9f5   : > { %v1025_v44 = vmul.f32 %v1020_v40, %v982_v10  ;;  %1031 = vrot.lane.b32.xlu0 %v1026_v39, %s1272_s9 }
 0x9f7   : > { %1029 = vrot.lane.b32.xlu1 %v1025_v44, %s1272_s9 }
 0x9f9   : > { %1042 = vperm.xlu0 %1224, %v1016_v30  }
 0x9fb   : > { %1038 = vperm.xlu1 %1223, %v1015_v33  }
 0x9fd   : > { %1226 = vset.pattern.permute.xlu0 %v1273_v45 }
 0x9ff   : > { %1225 = vset.pattern.permute.xlu1 %v1273_v45 }
 0xa67   : > { %v1032_v3 = vpop.permute.xlu0 %1031 }
 0xa68   : > { %v1036_v8 = vsub.f32 %v1469_v58, %v1032_v3 }
 0xa69   : > { %v1030_v47 = vpop.permute.xlu1 %1029 }
 0xa6a   : > { %v1035_v48 = vsub.f32 %v1464_v57, %v1030_v47 }
 0xa6c   : > { %1051 = vperm.xlu1 %1225, %v1035_v48  }
 0xa70   : > { %1056 = vperm.xlu1 %1225, %v1036_v8  }
 0xa74   : > { %v1043_v55 = vpop.permute.xlu0 %1042 }
 0xa75   : > { %v1047_v32 = vmul.f32 %v1043_v55, %v1639_v12  ;;  %v1048_v15 = vmul.f32 %v1043_v55, %v1643_v36 }
 0xa76   : > { %v1039_v26 = vpop.permute.xlu1 %1038 }
 0xa77   : > { %v1045_v53 = vmul.f32 %v1039_v26, %v1641_v37  ;;  %v1046_v54 = vmul.f32 %v1039_v26, %v1637_v28 }
 0xae7   : > { %v1052_v56 = vpop.permute.xlu1 %1051 }
 0xae8   : > { %v1059_v59 = vadd.f32 %v1052_v56, %v1045_v53  ;;  %v1060_v25 = vadd.f32 %v1052_v56, %v1046_v54 }
 0xaea   : > { %v1063_v57 = vmax.f32 %v1059_v59, 0.0  ;;  %v1064_v9 = vmax.f32 %v1060_v25, 0.0 }
 0xaeb   : > { %v1057_v21 = vpop.permute.xlu1 %1056 }
 0xaec   : > { %v1067_v58 = vadd.f32 %v1063_v57, %v1320_v4  ;;  %v1068_v35 = vadd.f32 %v1064_v9, %v1324_v6  ;;  %v1061_v29 = vadd.f32 %v1057_v21, %v1047_v32  ;;  %v1062_v52 = vadd.f32 %v1057_v21, %v1048_v15 }
 0xaee   : > { %v1071_v28 = vmax.f32 %v1067_v58, 0.0  ;;  %v1072_v37 = vmax.f32 %v1068_v35, 0.0  ;;  %v1065_v41 = vmax.f32 %v1061_v29, 0.0  ;;  %v1066_v12 = vmax.f32 %v1062_v52, 0.0 }
 0xaf0   : > { %1075 = vst [vmem:[%s224_s13] sm:$0xff] %v1071_v28  ;;  %1076 = vst [vmem:[%s224_s13 + $0x8] sm:$0xff] %v1072_v37  ;;  %v1069_v36 = vadd.f32 %v1065_v41, %v1322_v5  ;;  %v1070_v42 = vadd.f32 %v1066_v12, %v1328_v11 }
 0xaf2   : > { %v1073_v4 = vmax.f32 %v1069_v36, 0.0  ;;  %v1074_v43 = vmax.f32 %v1070_v42, 0.0 }
 0xaf4   : > { %1077 = vst [vmem:[%s224_s13 + $0x10] sm:$0xff] %v1073_v4  ;;  %1078 = vst [vmem:[%s224_s13 + $0x18] sm:$0xff] %v1074_v43 }
 0xaf5 PF: > { %s15_s18 = sadd.s32 1, %s1247_s18  }
 0xaf6   : > { %p12_p4 = scmp.ge.s32.totalorder %s15_s18, 4  }
 0xaf8   :  { %14 = sbr.rel (!%p12_p4) target bundleno = 1 (0x1), region = 70 }

</bundles_post_ra>
